<compile_context>
chip_gen: v7x
topology: tpu7x:2x2x1
jax: 0.10.0
libtpu: 0.0.40
codegen_flags: <defaults>
</compile_context>

<pallas_src>
import functools
import math

import jax
import jax.numpy as jnp
from jax import lax
from jax.experimental import pallas as pl
from jax.experimental.pallas import tpu as pltpu


def _rglru_kernel(seg_ref, x_ref, h0_ref, w_ref, b_ref, c_ref,
                  y_ref, hlast_ref,
                  h_scr, a_scr, nx_scr,
                  *, heads_per_group, block_width, group_width, seq_tile, sub):
    """Processes one (batch element, width group, sequence tile)."""
    l_idx = pl.program_id(2)

    # Initialize the recurrent state from the cache on the first sequence tile.
    @pl.when(l_idx == 0)
    def _():
        h_scr[...] = h0_ref[...].astype(jnp.float32)

    reset = (seg_ref[...] == 0).astype(jnp.float32)         # (Lt, 1)
    not_reset = 1.0 - reset

    # --- Fused block-diagonal gate projections + gating math, per head. ---
    # One MXU dot per head computes both gates (N = 2*block_width).  All
    # elementwise math stays on (Lt, block_width) chunks (bounded live f32
    # temporaries); results go straight into f32 VMEM scratch slabs.
    for h in range(heads_per_group):
        lo = h * block_width
        xh = x_ref[:, lo:lo + block_width]                  # (Lt, bw)
        g = jnp.dot(xh, w_ref[h], preferred_element_type=jnp.float32)
        g = jax.nn.sigmoid(g + b_ref[h])                    # (Lt, 2*bw)
        gate_x = g[:, :block_width]
        gate_a = g[:, block_width:]
        log_a = gate_a * c_ref[h]                           # c = -8 * softplus(a_param)
        a = jnp.exp(log_a)
        mult = jnp.sqrt(1.0 - a * a)                        # SqrtBoundDerivative fwd == sqrt
        mult = reset + not_reset * mult
        nx_scr[:, lo:lo + block_width] = xh.astype(jnp.float32) * gate_x * mult
        a_scr[:, lo:lo + block_width] = a * not_reset       # zero recurrence at resets

    # --- Blocked linear recurrence: `sub`-row slabs, Hillis-Steele prefix scan
    # over the sublanes, one dense (sub, width) store per slab. ---
    if sub > 1:
        row_ids = lax.broadcasted_iota(jnp.int32, (sub, group_width), 0)

    def blk_step(i, carry):                                 # carry: (1, gw) f32
        r = pl.multiple_of(i * sub, sub)
        a_blk = a_scr[pl.ds(r, sub), :]
        x_blk = nx_scr[pl.ds(r, sub), :]
        d = 1
        while d < sub:                                      # 3 log-steps for sub == 8
            keep = row_ids >= d
            a_sh = jnp.where(keep, pltpu.roll(a_blk, shift=d, axis=0), 1.0)
            x_sh = jnp.where(keep, pltpu.roll(x_blk, shift=d, axis=0), 0.0)
            x_blk = a_blk * x_sh + x_blk                    # combine with element d back
            a_blk = a_blk * a_sh
            d *= 2
        y_blk = a_blk * carry + x_blk                       # apply incoming state
        y_ref[pl.ds(r, sub), :] = y_blk.astype(y_ref.dtype)
        return y_blk[sub - 1:sub, :]                        # new carry = last row

    h_final = lax.fori_loop(0, seq_tile // sub, blk_step, h_scr[...])
    h_scr[...] = h_final                                    # carry across seq tiles

    @pl.when(l_idx == pl.num_programs(2) - 1)
    def _():
        hlast_ref[...] = h_final


def _vmem_capacity_bytes():
    try:
        return int(pltpu.get_tpu_info().vmem_capacity_bytes)
    except Exception:
        return 64 * 1024 * 1024          # conservative: v7x per-TensorCore VMEM


def _pick_width_groups(num_heads, block_width):
    """Smallest lane-aligned head-group split (>=2) for a parallel grid axis."""
    for g in (2, 4, 8):
        if num_heads % g == 0 and ((num_heads // g) * block_width) % 128 == 0:
            return g
    return 1


def _pick_seq_tile(seq_len, group_width, x_bytes, budget_bytes):
    """Largest sequence tile (divisor of seq_len, ideally a multiple of 8) whose
    per-tile footprint fits the VMEM budget.  Never pads the sequence."""
    per_row = group_width * (4 * x_bytes + 2 * 4 + 6 * 4)   # x/y dbl-buf + scratch + temps
    cap = max(1, budget_bytes // max(per_row, 1))
    cap = int(min(cap, 512, seq_len))
    divisors = [t for t in range(1, cap + 1) if seq_len % t == 0]
    mult8 = [t for t in divisors if t % 8 == 0]
    t = max(mult8) if mult8 else max(divisors)
    if t % 8 and t != seq_len:
        t = seq_len            # rare awkward lengths: one full-length tile (still correct)
    return t


def rg_lru(x, segment_pos, w_x, b_x, w_a, b_a, a_param, cache=None):
    """RG-LRU forward. Returns (y, last_h) matching RGLRU.forward semantics."""
    batch, seq_len, width = x.shape
    num_heads, block_width, _ = w_x.shape
    assert width == num_heads * block_width
    assert segment_pos.shape == (batch, seq_len)

    if cache is None:
        cache = jnp.zeros((batch, width), dtype=jnp.float32)

    dbytes = x.dtype.itemsize
    phys_vmem = _vmem_capacity_bytes()

    num_groups = _pick_width_groups(num_heads, block_width)
    heads_per_group = num_heads // num_groups
    group_width = heads_per_group * block_width

    seq_tile = _pick_seq_tile(seq_len, group_width, dbytes, phys_vmem // 2)
    num_seq_tiles = seq_len // seq_tile
    sub = 8
    while sub > 1 and seq_tile % sub:
        sub //= 2

    # --- Wrapper-side layout plumbing (one-time, free). ---
    seg3 = segment_pos.astype(jnp.int32).reshape(batch, seq_len, 1)
    h0 = cache.astype(jnp.float32).reshape(batch, 1, width)
    # Fuse both gate projections: one (bw, 2*bw) weight / (1, 2*bw) bias per head.
    w_fused = jnp.concatenate([w_x, w_a], axis=-1)                    # (H, bw, 2bw)
    b_fused = jnp.concatenate([b_x, b_a], axis=-1).reshape(num_heads, 1, 2 * block_width)
    # Precompute -8 * softplus(a_param) once (overflow-safe), per head.
    c = (-8.0 * jax.nn.softplus(a_param.astype(jnp.float32))).reshape(
        num_heads, 1, block_width)

    # Per-tile VMEM footprint -> explicit scoped-VMEM limit (default is 16/32 MiB).
    est = (4 * seq_tile * group_width * dbytes            # x + y, double-buffered
           + 2 * seq_tile * group_width * 4               # a_scr + nx_scr (f32)
           + 10 * seq_tile * block_width * 4              # live per-head f32 temps
           + 4 * heads_per_group * block_width * 2 * block_width * w_fused.dtype.itemsize
           + (2 << 20))
    vmem_limit = int(max(32 << 20, min(est * 2, phys_vmem - (8 << 20))))

    cost = pl.CostEstimate(
        flops=int(4 * batch * seq_len * width * block_width        # fused gate matmuls
                  + 20 * batch * seq_len * width),                 # gating + scan VALU
        transcendentals=int(4 * batch * seq_len * width),          # 2 sigmoid + exp + sqrt
        bytes_accessed=int(2 * dbytes * batch * seq_len * width    # x in, y out
                           + 4 * batch * seq_len                   # segment_pos
                           + 4 * num_heads * block_width * block_width * w_fused.dtype.itemsize
                           + 2 * 4 * batch * width),               # cache in/out
    )

    kernel = functools.partial(
        _rglru_kernel,
        heads_per_group=heads_per_group, block_width=block_width,
        group_width=group_width, seq_tile=seq_tile, sub=sub)

    y, last_h = pl.pallas_call(
        kernel,
        out_shape=(
            jax.ShapeDtypeStruct((batch, seq_len, width), x.dtype),
            jax.ShapeDtypeStruct((batch, 1, width), jnp.float32),
        ),
        grid_spec=pltpu.PrefetchScalarGridSpec(
            num_scalar_prefetch=0,
            grid=(batch, num_groups, num_seq_tiles),
            in_specs=[
                pl.BlockSpec((None, seq_tile, 1), lambda b, g, l: (b, l, 0)),           # segment_pos
                pl.BlockSpec((None, seq_tile, group_width), lambda b, g, l: (b, l, g)), # x
                pl.BlockSpec((None, 1, group_width), lambda b, g, l: (b, 0, g)),        # cache h0
                pl.BlockSpec((heads_per_group, block_width, 2 * block_width),
                             lambda b, g, l: (g, 0, 0)),                                # fused W
                pl.BlockSpec((heads_per_group, 1, 2 * block_width),
                             lambda b, g, l: (g, 0, 0)),                                # fused b
                pl.BlockSpec((heads_per_group, 1, block_width),
                             lambda b, g, l: (g, 0, 0)),                                # -8*softplus(a)
            ],
            out_specs=[
                pl.BlockSpec((None, seq_tile, group_width), lambda b, g, l: (b, l, g)), # y
                pl.BlockSpec((None, 1, group_width), lambda b, g, l: (b, 0, g)),        # last_h
            ],
            scratch_shapes=[
                pltpu.VMEM((1, group_width), jnp.float32),          # recurrent state carry
                pltpu.VMEM((seq_tile, group_width), jnp.float32),   # gated `a`
                pltpu.VMEM((seq_tile, group_width), jnp.float32),   # normalized_x
            ],
        ),
        compiler_params=pltpu.CompilerParams(
            dimension_semantics=("parallel", "parallel", "arbitrary"),
            vmem_limit_bytes=vmem_limit,
        ),
        cost_estimate=cost,
    )(seg3, x, h0, w_fused, b_fused, c)

    return y, last_h.reshape(batch, width)


# ----------------------------- init + reference ------------------------------

def a_param_init(key, width, min_rad=0.9, max_rad=0.999, eps=1e-8):
    """JAX port of rnn_param_init (softplus transform)."""
    u = jax.random.uniform(key, (width,), dtype=jnp.float32,
                           minval=min_rad ** 2 + eps, maxval=max_rad ** 2 + eps)
    x = 0.5 * jnp.log(u)
    return jnp.log(jnp.exp(-x) - 1.0)


def reference(x, segment_pos, w_x, b_x, w_a, b_a, a_param, h0):
    """Pure-JAX mirror of RGLRU.forward (f32 path)."""
    b, l, w = x.shape
    nh, bw, _ = w_x.shape

    def bdl(inp, wt, bias):
        xh = inp.reshape(b, l, nh, bw)
        y = jnp.einsum("blhi,hij->blhj", xh, wt) + bias
        return y.reshape(b, l, w)

    reset = (segment_pos == 0)
    gate_x = jax.nn.sigmoid(bdl(x, w_x, b_x))
    gate_a = jax.nn.sigmoid(bdl(x, w_a, b_a))
    log_a = -8.0 * gate_a * jax.nn.softplus(a_param)
    a = jnp.exp(log_a)
    a_sq = jnp.exp(2.0 * log_a)
    gated_x = x * gate_x
    r = reset[..., None].astype(x.dtype)
    multiplier = r + (1.0 - r) * jnp.sqrt(1.0 - a_sq)
    normalized_x = gated_x * multiplier
    a = a * (1.0 - r)

    h = h0.astype(jnp.float32)
    ys = []
    for t in range(l):
        h = a[:, t].astype(jnp.float32) * h + normalized_x[:, t].astype(jnp.float32)
        ys.append(h.astype(x.dtype))
    return jnp.stack(ys, axis=1), h


if __name__ == "__main__":
    batch, seq, width, num_heads = 2, 8, 32, 4
    block_width = width // num_heads

    key = jax.random.PRNGKey(0)
    kx, kwx, kbx, kwa, kba, ka, kc = jax.random.split(key, 7)

    x = jax.random.normal(kx, (batch, seq, width), dtype=jnp.float32)
    # batch 0: two documents (mid-sequence reset); batch 1: continuation (uses cache)
    segment_pos = jnp.stack([
        jnp.array([0, 1, 2, 3, 0, 1, 2, 3], dtype=jnp.int32),
        jnp.arange(5, 5 + seq, dtype=jnp.int32),
    ])

    std = math.sqrt(1.0 / block_width)
    w_x = std * jax.random.normal(kwx, (num_heads, block_width, block_width), dtype=jnp.float32)
    b_x = 0.1 * jax.random.normal(kbx, (num_heads, block_width), dtype=jnp.float32)
    w_a = std * jax.random.normal(kwa, (num_heads, block_width, block_width), dtype=jnp.float32)
    b_a = 0.1 * jax.random.normal(kba, (num_heads, block_width), dtype=jnp.float32)
    a_param = a_param_init(ka, width)
    cache = 0.5 * jax.random.normal(kc, (batch, width), dtype=jnp.float32)

    y, last_h = rg_lru(x, segment_pos, w_x, b_x, w_a, b_a, a_param, cache)
    y = jax.block_until_ready(y)
    last_h = jax.block_until_ready(last_h)

    y_ref, h_ref = reference(x, segment_pos, w_x, b_x, w_a, b_a, a_param, cache)

    assert y.shape == x.shape, (y.shape, x.shape)
    assert last_h.shape == (batch, width), last_h.shape
    assert jnp.allclose(y, y_ref, atol=1e-4, rtol=1e-4), "y mismatch vs reference"
    assert jnp.allclose(last_h, h_ref, atol=1e-4, rtol=1e-4), "last_h mismatch vs reference"

    print("KERNEL_OK")
</pallas_src>

<mosaic_0001>
module attributes {stable_mosaic.version = 11 : i64} {
  func.func @_rglru_kernel(%arg0: i32, %arg1: i32, %arg2: i32, %arg3: memref<1x8x1xi32, #tpu.memory_space<vmem>>, %arg4: memref<1x8x32xf32, #tpu.memory_space<vmem>>, %arg5: memref<1x1x32xf32, #tpu.memory_space<vmem>>, %arg6: memref<4x8x16xf32, #tpu.memory_space<vmem>>, %arg7: memref<4x1x16xf32, #tpu.memory_space<vmem>>, %arg8: memref<4x1x8xf32, #tpu.memory_space<vmem>>, %arg9: memref<1x8x32xf32, #tpu.memory_space<vmem>>, %arg10: memref<1x1x32xf32, #tpu.memory_space<vmem>>, %arg11: memref<1x32xf32, #tpu.memory_space<vmem>>, %arg12: memref<8x32xf32, #tpu.memory_space<vmem>>, %arg13: memref<8x32xf32, #tpu.memory_space<vmem>>) attributes {dimension_semantics = [#tpu.dimension_semantics<parallel>, #tpu.dimension_semantics<parallel>, #tpu.dimension_semantics<arbitrary>], iteration_bounds = array<i64: 2, 1, 1>, scalar_prefetch = 0 : i64, scratch_operands = 3 : i64, tpu.core_type = #tpu.core_type<tc>, window_params = [{transform_indices = @transform_0, window_bounds = array<i64: 1, 8, 1>}, {transform_indices = @transform_1, window_bounds = array<i64: 1, 8, 32>}, {transform_indices = @transform_2, window_bounds = array<i64: 1, 1, 32>}, {transform_indices = @transform_3, window_bounds = array<i64: 4, 8, 16>}, {transform_indices = @transform_4, window_bounds = array<i64: 4, 1, 16>}, {transform_indices = @transform_5, window_bounds = array<i64: 4, 1, 8>}, {transform_indices = @transform_6, window_bounds = array<i64: 1, 8, 32>}, {transform_indices = @transform_7, window_bounds = array<i64: 1, 1, 32>}]} {
    %c0_i32 = arith.constant 0 : i32
    %0 = arith.cmpi eq, %arg2, %c0_i32 : i32
    %1 = arith.extui %0 : i1 to i32
    %c0_i32_0 = arith.constant 0 : i32
    %2 = arith.cmpi ne, %1, %c0_i32_0 : i32
    scf.if %2 {
      %c0_98 = arith.constant 0 : index
      %c0_99 = arith.constant 0 : index
      %c0_100 = arith.constant 0 : index
      %204 = vector.load %arg5[%c0_98, %c0_99, %c0_100] : memref<1x1x32xf32, #tpu.memory_space<vmem>>, vector<1x1x32xf32>
      %205 = vector.shape_cast %204 : vector<1x1x32xf32> to vector<1x32xf32>
      %c0_101 = arith.constant 0 : index
      %c0_102 = arith.constant 0 : index
      %206 = vector.load %arg11[%c0_101, %c0_102] : memref<1x32xf32, #tpu.memory_space<vmem>>, vector<1x32xf32>
      tpu.vector_store %arg11[%c0_101, %c0_102], %205 {strides = array<i32>} : memref<1x32xf32, #tpu.memory_space<vmem>>, vector<1x32xf32>,
    } else {
    }
    %c0 = arith.constant 0 : index
    %c0_1 = arith.constant 0 : index
    %c0_2 = arith.constant 0 : index
    %3 = vector.load %arg3[%c0, %c0_1, %c0_2] : memref<1x8x1xi32, #tpu.memory_space<vmem>>, vector<1x8x1xi32>
    %4 = vector.shape_cast %3 : vector<1x8x1xi32> to vector<8x1xi32>
    %c0_i32_3 = arith.constant 0 : i32
    %5 = vector.broadcast %c0_i32_3 : i32 to vector<8x1xi32>
    %6 = arith.cmpi eq, %4, %5 : vector<8x1xi32>
    %7 = arith.extui %6 : vector<8x1xi1> to vector<8x1xi32>
    %8 = arith.sitofp %7 : vector<8x1xi32> to vector<8x1xf32>
    %cst = arith.constant 1.000000e+00 : f32
    %9 = vector.broadcast %cst : f32 to vector<8x1xf32>
    %10 = arith.subf %9, %8 : vector<8x1xf32>
    %c0_4 = arith.constant 0 : index
    %c0_5 = arith.constant 0 : index
    %c0_6 = arith.constant 0 : index
    %11 = vector.load %arg4[%c0_4, %c0_5, %c0_6] : memref<1x8x32xf32, #tpu.memory_space<vmem>>, vector<1x8x8xf32>
    %12 = vector.shape_cast %11 : vector<1x8x8xf32> to vector<8x8xf32>
    %c0_7 = arith.constant 0 : index
    %c0_8 = arith.constant 0 : index
    %c0_9 = arith.constant 0 : index
    %13 = vector.load %arg6[%c0_7, %c0_8, %c0_9] : memref<4x8x16xf32, #tpu.memory_space<vmem>>, vector<1x8x16xf32>
    %14 = vector.shape_cast %13 : vector<1x8x16xf32> to vector<8x16xf32>
    %cst_10 = arith.constant dense<0.000000e+00> : vector<8x16xf32>
    %15 = tpu.matmul %12, %14, %cst_10 {dimension_numbers = #tpu.dot_dimension_numbers<[1], [0], [0], [1], [0, 0, 1, 1], [], []>} : vector<8x8xf32>, vector<8x16xf32>, vector<8x16xf32> -> vector<8x16xf32>
    %c0_11 = arith.constant 0 : index
    %c0_12 = arith.constant 0 : index
    %c0_13 = arith.constant 0 : index
    %16 = vector.load %arg7[%c0_11, %c0_12, %c0_13] : memref<4x1x16xf32, #tpu.memory_space<vmem>>, vector<1x1x16xf32>
    %17 = vector.shape_cast %16 : vector<1x1x16xf32> to vector<1x16xf32>
    %18 = vector.broadcast %17 : vector<1x16xf32> to vector<8x16xf32>
    %19 = arith.addf %15, %18 : vector<8x16xf32>
    %20 = arith.negf %19 : vector<8x16xf32>
    %21 = math.exp %20 : vector<8x16xf32>
    %cst_14 = arith.constant 1.000000e+00 : f32
    %22 = vector.broadcast %cst_14 : f32 to vector<8x16xf32>
    %23 = arith.addf %22, %21 : vector<8x16xf32>
    %24 = arith.divf %22, %23 : vector<8x16xf32>
    %25 = vector.extract_strided_slice %24 {offsets = [0, 0], sizes = [8, 8], strides = [1, 1]} : vector<8x16xf32> to vector<8x8xf32>
    %26 = vector.extract_strided_slice %24 {offsets = [0, 8], sizes = [8, 8], strides = [1, 1]} : vector<8x16xf32> to vector<8x8xf32>
    %c0_15 = arith.constant 0 : index
    %c0_16 = arith.constant 0 : index
    %c0_17 = arith.constant 0 : index
    %27 = vector.load %arg8[%c0_15, %c0_16, %c0_17] : memref<4x1x8xf32, #tpu.memory_space<vmem>>, vector<1x1x8xf32>
    %28 = vector.shape_cast %27 : vector<1x1x8xf32> to vector<1x8xf32>
    %29 = vector.broadcast %28 : vector<1x8xf32> to vector<8x8xf32>
    %30 = arith.mulf %26, %29 : vector<8x8xf32>
    %31 = math.exp %30 : vector<8x8xf32>
    %32 = arith.mulf %31, %31 : vector<8x8xf32>
    %cst_18 = arith.constant 1.000000e+00 : f32
    %33 = vector.broadcast %cst_18 : f32 to vector<8x8xf32>
    %34 = arith.subf %33, %32 : vector<8x8xf32>
    %35 = math.sqrt %34 : vector<8x8xf32>
    %36 = vector.broadcast %10 : vector<8x1xf32> to vector<8x8xf32>
    %37 = arith.mulf %36, %35 : vector<8x8xf32>
    %38 = vector.broadcast %8 : vector<8x1xf32> to vector<8x8xf32>
    %39 = arith.addf %38, %37 : vector<8x8xf32>
    %40 = arith.mulf %12, %25 : vector<8x8xf32>
    %41 = arith.mulf %40, %39 : vector<8x8xf32>
    %c0_19 = arith.constant 0 : index
    %c0_20 = arith.constant 0 : index
    %42 = vector.load %arg13[%c0_19, %c0_20] : memref<8x32xf32, #tpu.memory_space<vmem>>, vector<8x8xf32>
    tpu.vector_store %arg13[%c0_19, %c0_20], %41 {strides = array<i32>} : memref<8x32xf32, #tpu.memory_space<vmem>>, vector<8x8xf32>,
    %43 = vector.broadcast %10 : vector<8x1xf32> to vector<8x8xf32>
    %44 = arith.mulf %31, %43 : vector<8x8xf32>
    %c0_21 = arith.constant 0 : index
    %c0_22 = arith.constant 0 : index
    %45 = vector.load %arg12[%c0_21, %c0_22] : memref<8x32xf32, #tpu.memory_space<vmem>>, vector<8x8xf32>
    tpu.vector_store %arg12[%c0_21, %c0_22], %44 {strides = array<i32>} : memref<8x32xf32, #tpu.memory_space<vmem>>, vector<8x8xf32>,
    %c0_23 = arith.constant 0 : index
    %c0_24 = arith.constant 0 : index
    %c8 = arith.constant 8 : index
    %46 = vector.load %arg4[%c0_23, %c0_24, %c8] : memref<1x8x32xf32, #tpu.memory_space<vmem>>, vector<1x8x8xf32>
    %47 = vector.shape_cast %46 : vector<1x8x8xf32> to vector<8x8xf32>
    %c1 = arith.constant 1 : index
    %c0_25 = arith.constant 0 : index
    %c0_26 = arith.constant 0 : index
    %48 = vector.load %arg6[%c1, %c0_25, %c0_26] : memref<4x8x16xf32, #tpu.memory_space<vmem>>, vector<1x8x16xf32>
    %49 = vector.shape_cast %48 : vector<1x8x16xf32> to vector<8x16xf32>
    %cst_27 = arith.constant dense<0.000000e+00> : vector<8x16xf32>
    %50 = tpu.matmul %47, %49, %cst_27 {dimension_numbers = #tpu.dot_dimension_numbers<[1], [0], [0], [1], [0, 0, 1, 1], [], []>} : vector<8x8xf32>, vector<8x16xf32>, vector<8x16xf32> -> vector<8x16xf32>
    %c1_28 = arith.constant 1 : index
    %c0_29 = arith.constant 0 : index
    %c0_30 = arith.constant 0 : index
    %51 = vector.load %arg7[%c1_28, %c0_29, %c0_30] : memref<4x1x16xf32, #tpu.memory_space<vmem>>, vector<1x1x16xf32>
    %52 = vector.shape_cast %51 : vector<1x1x16xf32> to vector<1x16xf32>
    %53 = vector.broadcast %52 : vector<1x16xf32> to vector<8x16xf32>
    %54 = arith.addf %50, %53 : vector<8x16xf32>
    %55 = arith.negf %54 : vector<8x16xf32>
    %56 = math.exp %55 : vector<8x16xf32>
    %cst_31 = arith.constant 1.000000e+00 : f32
    %57 = vector.broadcast %cst_31 : f32 to vector<8x16xf32>
    %58 = arith.addf %57, %56 : vector<8x16xf32>
    %59 = arith.divf %57, %58 : vector<8x16xf32>
    %60 = vector.extract_strided_slice %59 {offsets = [0, 0], sizes = [8, 8], strides = [1, 1]} : vector<8x16xf32> to vector<8x8xf32>
    %61 = vector.extract_strided_slice %59 {offsets = [0, 8], sizes = [8, 8], strides = [1, 1]} : vector<8x16xf32> to vector<8x8xf32>
    %c1_32 = arith.constant 1 : index
    %c0_33 = arith.constant 0 : index
    %c0_34 = arith.constant 0 : index
    %62 = vector.load %arg8[%c1_32, %c0_33, %c0_34] : memref<4x1x8xf32, #tpu.memory_space<vmem>>, vector<1x1x8xf32>
    %63 = vector.shape_cast %62 : vector<1x1x8xf32> to vector<1x8xf32>
    %64 = vector.broadcast %63 : vector<1x8xf32> to vector<8x8xf32>
    %65 = arith.mulf %61, %64 : vector<8x8xf32>
    %66 = math.exp %65 : vector<8x8xf32>
    %67 = arith.mulf %66, %66 : vector<8x8xf32>
    %cst_35 = arith.constant 1.000000e+00 : f32
    %68 = vector.broadcast %cst_35 : f32 to vector<8x8xf32>
    %69 = arith.subf %68, %67 : vector<8x8xf32>
    %70 = math.sqrt %69 : vector<8x8xf32>
    %71 = vector.broadcast %10 : vector<8x1xf32> to vector<8x8xf32>
    %72 = arith.mulf %71, %70 : vector<8x8xf32>
    %73 = vector.broadcast %8 : vector<8x1xf32> to vector<8x8xf32>
    %74 = arith.addf %73, %72 : vector<8x8xf32>
    %75 = arith.mulf %47, %60 : vector<8x8xf32>
    %76 = arith.mulf %75, %74 : vector<8x8xf32>
    %c0_36 = arith.constant 0 : index
    %c8_37 = arith.constant 8 : index
    %77 = vector.load %arg13[%c0_36, %c8_37] : memref<8x32xf32, #tpu.memory_space<vmem>>, vector<8x8xf32>
    tpu.vector_store %arg13[%c0_36, %c8_37], %76 {strides = array<i32>} : memref<8x32xf32, #tpu.memory_space<vmem>>, vector<8x8xf32>,
    %78 = vector.broadcast %10 : vector<8x1xf32> to vector<8x8xf32>
    %79 = arith.mulf %66, %78 : vector<8x8xf32>
    %c0_38 = arith.constant 0 : index
    %c8_39 = arith.constant 8 : index
    %80 = vector.load %arg12[%c0_38, %c8_39] : memref<8x32xf32, #tpu.memory_space<vmem>>, vector<8x8xf32>
    tpu.vector_store %arg12[%c0_38, %c8_39], %79 {strides = array<i32>} : memref<8x32xf32, #tpu.memory_space<vmem>>, vector<8x8xf32>,
    %c0_40 = arith.constant 0 : index
    %c0_41 = arith.constant 0 : index
    %c16 = arith.constant 16 : index
    %81 = vector.load %arg4[%c0_40, %c0_41, %c16] : memref<1x8x32xf32, #tpu.memory_space<vmem>>, vector<1x8x8xf32>
    %82 = vector.shape_cast %81 : vector<1x8x8xf32> to vector<8x8xf32>
    %c2 = arith.constant 2 : index
    %c0_42 = arith.constant 0 : index
    %c0_43 = arith.constant 0 : index
    %83 = vector.load %arg6[%c2, %c0_42, %c0_43] : memref<4x8x16xf32, #tpu.memory_space<vmem>>, vector<1x8x16xf32>
    %84 = vector.shape_cast %83 : vector<1x8x16xf32> to vector<8x16xf32>
    %cst_44 = arith.constant dense<0.000000e+00> : vector<8x16xf32>
    %85 = tpu.matmul %82, %84, %cst_44 {dimension_numbers = #tpu.dot_dimension_numbers<[1], [0], [0], [1], [0, 0, 1, 1], [], []>} : vector<8x8xf32>, vector<8x16xf32>, vector<8x16xf32> -> vector<8x16xf32>
    %c2_45 = arith.constant 2 : index
    %c0_46 = arith.constant 0 : index
    %c0_47 = arith.constant 0 : index
    %86 = vector.load %arg7[%c2_45, %c0_46, %c0_47] : memref<4x1x16xf32, #tpu.memory_space<vmem>>, vector<1x1x16xf32>
    %87 = vector.shape_cast %86 : vector<1x1x16xf32> to vector<1x16xf32>
    %88 = vector.broadcast %87 : vector<1x16xf32> to vector<8x16xf32>
    %89 = arith.addf %85, %88 : vector<8x16xf32>
    %90 = arith.negf %89 : vector<8x16xf32>
    %91 = math.exp %90 : vector<8x16xf32>
    %cst_48 = arith.constant 1.000000e+00 : f32
    %92 = vector.broadcast %cst_48 : f32 to vector<8x16xf32>
    %93 = arith.addf %92, %91 : vector<8x16xf32>
    %94 = arith.divf %92, %93 : vector<8x16xf32>
    %95 = vector.extract_strided_slice %94 {offsets = [0, 0], sizes = [8, 8], strides = [1, 1]} : vector<8x16xf32> to vector<8x8xf32>
    %96 = vector.extract_strided_slice %94 {offsets = [0, 8], sizes = [8, 8], strides = [1, 1]} : vector<8x16xf32> to vector<8x8xf32>
    %c2_49 = arith.constant 2 : index
    %c0_50 = arith.constant 0 : index
    %c0_51 = arith.constant 0 : index
    %97 = vector.load %arg8[%c2_49, %c0_50, %c0_51] : memref<4x1x8xf32, #tpu.memory_space<vmem>>, vector<1x1x8xf32>
    %98 = vector.shape_cast %97 : vector<1x1x8xf32> to vector<1x8xf32>
    %99 = vector.broadcast %98 : vector<1x8xf32> to vector<8x8xf32>
    %100 = arith.mulf %96, %99 : vector<8x8xf32>
    %101 = math.exp %100 : vector<8x8xf32>
    %102 = arith.mulf %101, %101 : vector<8x8xf32>
    %cst_52 = arith.constant 1.000000e+00 : f32
    %103 = vector.broadcast %cst_52 : f32 to vector<8x8xf32>
    %104 = arith.subf %103, %102 : vector<8x8xf32>
    %105 = math.sqrt %104 : vector<8x8xf32>
    %106 = vector.broadcast %10 : vector<8x1xf32> to vector<8x8xf32>
    %107 = arith.mulf %106, %105 : vector<8x8xf32>
    %108 = vector.broadcast %8 : vector<8x1xf32> to vector<8x8xf32>
    %109 = arith.addf %108, %107 : vector<8x8xf32>
    %110 = arith.mulf %82, %95 : vector<8x8xf32>
    %111 = arith.mulf %110, %109 : vector<8x8xf32>
    %c0_53 = arith.constant 0 : index
    %c16_54 = arith.constant 16 : index
    %112 = vector.load %arg13[%c0_53, %c16_54] : memref<8x32xf32, #tpu.memory_space<vmem>>, vector<8x8xf32>
    tpu.vector_store %arg13[%c0_53, %c16_54], %111 {strides = array<i32>} : memref<8x32xf32, #tpu.memory_space<vmem>>, vector<8x8xf32>,
    %113 = vector.broadcast %10 : vector<8x1xf32> to vector<8x8xf32>
    %114 = arith.mulf %101, %113 : vector<8x8xf32>
    %c0_55 = arith.constant 0 : index
    %c16_56 = arith.constant 16 : index
    %115 = vector.load %arg12[%c0_55, %c16_56] : memref<8x32xf32, #tpu.memory_space<vmem>>, vector<8x8xf32>
    tpu.vector_store %arg12[%c0_55, %c16_56], %114 {strides = array<i32>} : memref<8x32xf32, #tpu.memory_space<vmem>>, vector<8x8xf32>,
    %c0_57 = arith.constant 0 : index
    %c0_58 = arith.constant 0 : index
    %c24 = arith.constant 24 : index
    %116 = vector.load %arg4[%c0_57, %c0_58, %c24] : memref<1x8x32xf32, #tpu.memory_space<vmem>>, vector<1x8x8xf32>
    %117 = vector.shape_cast %116 : vector<1x8x8xf32> to vector<8x8xf32>
    %c3 = arith.constant 3 : index
    %c0_59 = arith.constant 0 : index
    %c0_60 = arith.constant 0 : index
    %118 = vector.load %arg6[%c3, %c0_59, %c0_60] : memref<4x8x16xf32, #tpu.memory_space<vmem>>, vector<1x8x16xf32>
    %119 = vector.shape_cast %118 : vector<1x8x16xf32> to vector<8x16xf32>
    %cst_61 = arith.constant dense<0.000000e+00> : vector<8x16xf32>
    %120 = tpu.matmul %117, %119, %cst_61 {dimension_numbers = #tpu.dot_dimension_numbers<[1], [0], [0], [1], [0, 0, 1, 1], [], []>} : vector<8x8xf32>, vector<8x16xf32>, vector<8x16xf32> -> vector<8x16xf32>
    %c3_62 = arith.constant 3 : index
    %c0_63 = arith.constant 0 : index
    %c0_64 = arith.constant 0 : index
    %121 = vector.load %arg7[%c3_62, %c0_63, %c0_64] : memref<4x1x16xf32, #tpu.memory_space<vmem>>, vector<1x1x16xf32>
    %122 = vector.shape_cast %121 : vector<1x1x16xf32> to vector<1x16xf32>
    %123 = vector.broadcast %122 : vector<1x16xf32> to vector<8x16xf32>
    %124 = arith.addf %120, %123 : vector<8x16xf32>
    %125 = arith.negf %124 : vector<8x16xf32>
    %126 = math.exp %125 : vector<8x16xf32>
    %cst_65 = arith.constant 1.000000e+00 : f32
    %127 = vector.broadcast %cst_65 : f32 to vector<8x16xf32>
    %128 = arith.addf %127, %126 : vector<8x16xf32>
    %129 = arith.divf %127, %128 : vector<8x16xf32>
    %130 = vector.extract_strided_slice %129 {offsets = [0, 0], sizes = [8, 8], strides = [1, 1]} : vector<8x16xf32> to vector<8x8xf32>
    %131 = vector.extract_strided_slice %129 {offsets = [0, 8], sizes = [8, 8], strides = [1, 1]} : vector<8x16xf32> to vector<8x8xf32>
    %c3_66 = arith.constant 3 : index
    %c0_67 = arith.constant 0 : index
    %c0_68 = arith.constant 0 : index
    %132 = vector.load %arg8[%c3_66, %c0_67, %c0_68] : memref<4x1x8xf32, #tpu.memory_space<vmem>>, vector<1x1x8xf32>
    %133 = vector.shape_cast %132 : vector<1x1x8xf32> to vector<1x8xf32>
    %134 = vector.broadcast %133 : vector<1x8xf32> to vector<8x8xf32>
    %135 = arith.mulf %131, %134 : vector<8x8xf32>
    %136 = math.exp %135 : vector<8x8xf32>
    %137 = arith.mulf %136, %136 : vector<8x8xf32>
    %cst_69 = arith.constant 1.000000e+00 : f32
    %138 = vector.broadcast %cst_69 : f32 to vector<8x8xf32>
    %139 = arith.subf %138, %137 : vector<8x8xf32>
    %140 = math.sqrt %139 : vector<8x8xf32>
    %141 = vector.broadcast %10 : vector<8x1xf32> to vector<8x8xf32>
    %142 = arith.mulf %141, %140 : vector<8x8xf32>
    %143 = vector.broadcast %8 : vector<8x1xf32> to vector<8x8xf32>
    %144 = arith.addf %143, %142 : vector<8x8xf32>
    %145 = arith.mulf %117, %130 : vector<8x8xf32>
    %146 = arith.mulf %145, %144 : vector<8x8xf32>
    %c0_70 = arith.constant 0 : index
    %c24_71 = arith.constant 24 : index
    %147 = vector.load %arg13[%c0_70, %c24_71] : memref<8x32xf32, #tpu.memory_space<vmem>>, vector<8x8xf32>
    tpu.vector_store %arg13[%c0_70, %c24_71], %146 {strides = array<i32>} : memref<8x32xf32, #tpu.memory_space<vmem>>, vector<8x8xf32>,
    %148 = vector.broadcast %10 : vector<8x1xf32> to vector<8x8xf32>
    %149 = arith.mulf %136, %148 : vector<8x8xf32>
    %c0_72 = arith.constant 0 : index
    %c24_73 = arith.constant 24 : index
    %150 = vector.load %arg12[%c0_72, %c24_73] : memref<8x32xf32, #tpu.memory_space<vmem>>, vector<8x8xf32>
    tpu.vector_store %arg12[%c0_72, %c24_73], %149 {strides = array<i32>} : memref<8x32xf32, #tpu.memory_space<vmem>>, vector<8x8xf32>,
    %151 = tpu.iota {dimensions = array<i32: 0>} : vector<8x32xi32>
    %c0_74 = arith.constant 0 : index
    %c0_75 = arith.constant 0 : index
    %152 = vector.load %arg11[%c0_74, %c0_75] : memref<1x32xf32, #tpu.memory_space<vmem>>, vector<1x32xf32>
    %c0_i32_76 = arith.constant 0 : i32
    %c8_i32 = arith.constant 8 : i32
    %153 = arith.muli %c0_i32_76, %c8_i32 : i32
    %154 = tpu.assume_multiple %153, 8 : i32
    %155 = arith.index_cast %154 : i32 to index
    %c0_77 = arith.constant 0 : index
    %156 = vector.load %arg12[%155, %c0_77] : memref<8x32xf32, #tpu.memory_space<vmem>>, vector<8x32xf32>
    %157 = arith.index_cast %154 : i32 to index
    %c0_78 = arith.constant 0 : index
    %158 = vector.load %arg13[%157, %c0_78] : memref<8x32xf32, #tpu.memory_space<vmem>>, vector<8x32xf32>
    %c1_i32 = arith.constant 1 : i32
    %159 = vector.broadcast %c1_i32 : i32 to vector<8x32xi32>
    %160 = arith.cmpi sge, %151, %159 : vector<8x32xi32>
    %c1_i32_79 = arith.constant 1 : i32
    %161 = tpu.dynamic_rotate %156 by %c1_i32_79 dim 0 : vector<8x32xf32>, i32 -> vector<8x32xf32>
    %cst_80 = arith.constant 1.000000e+00 : f32
    %162 = vector.broadcast %cst_80 : f32 to vector<8x32xf32>
    %163 = arith.select %160, %161, %162 : vector<8x32xi1>, vector<8x32xf32>
    %c1_i32_81 = arith.constant 1 : i32
    %164 = tpu.dynamic_rotate %158 by %c1_i32_81 dim 0 : vector<8x32xf32>, i32 -> vector<8x32xf32>
    %cst_82 = arith.constant 0.000000e+00 : f32
    %165 = vector.broadcast %cst_82 : f32 to vector<8x32xf32>
    %166 = arith.select %160, %164, %165 : vector<8x32xi1>, vector<8x32xf32>
    %167 = arith.mulf %156, %166 : vector<8x32xf32>
    %168 = arith.addf %167, %158 : vector<8x32xf32>
    %169 = arith.mulf %156, %163 : vector<8x32xf32>
    %c2_i32 = arith.constant 2 : i32
    %170 = vector.broadcast %c2_i32 : i32 to vector<8x32xi32>
    %171 = arith.cmpi sge, %151, %170 : vector<8x32xi32>
    %c2_i32_83 = arith.constant 2 : i32
    %172 = tpu.dynamic_rotate %169 by %c2_i32_83 dim 0 : vector<8x32xf32>, i32 -> vector<8x32xf32>
    %cst_84 = arith.constant 1.000000e+00 : f32
    %173 = vector.broadcast %cst_84 : f32 to vector<8x32xf32>
    %174 = arith.select %171, %172, %173 : vector<8x32xi1>, vector<8x32xf32>
    %c2_i32_85 = arith.constant 2 : i32
    %175 = tpu.dynamic_rotate %168 by %c2_i32_85 dim 0 : vector<8x32xf32>, i32 -> vector<8x32xf32>
    %cst_86 = arith.constant 0.000000e+00 : f32
    %176 = vector.broadcast %cst_86 : f32 to vector<8x32xf32>
    %177 = arith.select %171, %175, %176 : vector<8x32xi1>, vector<8x32xf32>
    %178 = arith.mulf %169, %177 : vector<8x32xf32>
    %179 = arith.addf %178, %168 : vector<8x32xf32>
    %180 = arith.mulf %169, %174 : vector<8x32xf32>
    %c4_i32 = arith.constant 4 : i32
    %181 = vector.broadcast %c4_i32 : i32 to vector<8x32xi32>
    %182 = arith.cmpi sge, %151, %181 : vector<8x32xi32>
    %c4_i32_87 = arith.constant 4 : i32
    %183 = tpu.dynamic_rotate %180 by %c4_i32_87 dim 0 : vector<8x32xf32>, i32 -> vector<8x32xf32>
    %cst_88 = arith.constant 1.000000e+00 : f32
    %184 = vector.broadcast %cst_88 : f32 to vector<8x32xf32>
    %185 = arith.select %182, %183, %184 : vector<8x32xi1>, vector<8x32xf32>
    %c4_i32_89 = arith.constant 4 : i32
    %186 = tpu.dynamic_rotate %179 by %c4_i32_89 dim 0 : vector<8x32xf32>, i32 -> vector<8x32xf32>
    %cst_90 = arith.constant 0.000000e+00 : f32
    %187 = vector.broadcast %cst_90 : f32 to vector<8x32xf32>
    %188 = arith.select %182, %186, %187 : vector<8x32xi1>, vector<8x32xf32>
    %189 = arith.mulf %180, %188 : vector<8x32xf32>
    %190 = arith.addf %189, %179 : vector<8x32xf32>
    %191 = arith.mulf %180, %185 : vector<8x32xf32>
    %192 = vector.broadcast %152 : vector<1x32xf32> to vector<8x32xf32>
    %193 = arith.mulf %191, %192 : vector<8x32xf32>
    %194 = arith.addf %193, %190 : vector<8x32xf32>
    %c0_91 = arith.constant 0 : index
    %195 = arith.index_cast %154 : i32 to index
    %c0_92 = arith.constant 0 : index
    %196 = vector.load %arg9[%c0_91, %195, %c0_92] : memref<1x8x32xf32, #tpu.memory_space<vmem>>, vector<1x8x32xf32>
    %197 = vector.shape_cast %196 : vector<1x8x32xf32> to vector<8x32xf32>
    %198 = vector.shape_cast %194 : vector<8x32xf32> to vector<1x8x32xf32>
    tpu.vector_store %arg9[%c0_91, %195, %c0_92], %198 {strides = array<i32>} : memref<1x8x32xf32, #tpu.memory_space<vmem>>, vector<1x8x32xf32>,
    %199 = vector.extract_strided_slice %194 {offsets = [7, 0], sizes = [1, 32], strides = [1, 1]} : vector<8x32xf32> to vector<1x32xf32>
    %c1_i32_93 = arith.constant 1 : i32
    %c0_94 = arith.constant 0 : index
    %c0_95 = arith.constant 0 : index
    %200 = vector.load %arg11[%c0_94, %c0_95] : memref<1x32xf32, #tpu.memory_space<vmem>>, vector<1x32xf32>
    tpu.vector_store %arg11[%c0_94, %c0_95], %199 {strides = array<i32>} : memref<1x32xf32, #tpu.memory_space<vmem>>, vector<1x32xf32>,
    %c0_i32_96 = arith.constant 0 : i32
    %201 = arith.cmpi eq, %arg2, %c0_i32_96 : i32
    %202 = arith.extui %201 : i1 to i32
    %c0_i32_97 = arith.constant 0 : i32
    %203 = arith.cmpi ne, %202, %c0_i32_97 : i32
    scf.if %203 {
      %c0_98 = arith.constant 0 : index
      %c0_99 = arith.constant 0 : index
      %c0_100 = arith.constant 0 : index
      %204 = vector.load %arg10[%c0_98, %c0_99, %c0_100] : memref<1x1x32xf32, #tpu.memory_space<vmem>>, vector<1x1x32xf32>
      %205 = vector.shape_cast %204 : vector<1x1x32xf32> to vector<1x32xf32>
      %206 = vector.shape_cast %199 : vector<1x32xf32> to vector<1x1x32xf32>
      tpu.vector_store %arg10[%c0_98, %c0_99, %c0_100], %206 {strides = array<i32>} : memref<1x1x32xf32, #tpu.memory_space<vmem>>, vector<1x1x32xf32>,
    } else {
    }
    return
  }
  func.func @transform_0(%arg0: i32, %arg1: i32, %arg2: i32) -> (i32, i32, i32) {
    %c0_i32 = arith.constant 0 : i32
    %c0_i32_0 = arith.constant 0 : i32
    return %arg0, %arg2, %c0_i32 : i32, i32, i32
  }
  func.func @transform_1(%arg0: i32, %arg1: i32, %arg2: i32) -> (i32, i32, i32) {
    %c0_i32 = arith.constant 0 : i32
    return %arg0, %arg2, %arg1 : i32, i32, i32
  }
  func.func @transform_2(%arg0: i32, %arg1: i32, %arg2: i32) -> (i32, i32, i32) {
    %c0_i32 = arith.constant 0 : i32
    %c0_i32_0 = arith.constant 0 : i32
    return %arg0, %c0_i32, %arg1 : i32, i32, i32
  }
  func.func @transform_3(%arg0: i32, %arg1: i32, %arg2: i32) -> (i32, i32, i32) {
    %c0_i32 = arith.constant 0 : i32
    %c0_i32_0 = arith.constant 0 : i32
    %c0_i32_1 = arith.constant 0 : i32
    return %arg1, %c0_i32, %c0_i32_0 : i32, i32, i32
  }
  func.func @transform_4(%arg0: i32, %arg1: i32, %arg2: i32) -> (i32, i32, i32) {
    %c0_i32 = arith.constant 0 : i32
    %c0_i32_0 = arith.constant 0 : i32
    %c0_i32_1 = arith.constant 0 : i32
    return %arg1, %c0_i32, %c0_i32_0 : i32, i32, i32
  }
  func.func @transform_5(%arg0: i32, %arg1: i32, %arg2: i32) -> (i32, i32, i32) {
    %c0_i32 = arith.constant 0 : i32
    %c0_i32_0 = arith.constant 0 : i32
    %c0_i32_1 = arith.constant 0 : i32
    return %arg1, %c0_i32, %c0_i32_0 : i32, i32, i32
  }
  func.func @transform_6(%arg0: i32, %arg1: i32, %arg2: i32) -> (i32, i32, i32) {
    %c0_i32 = arith.constant 0 : i32
    return %arg0, %arg2, %arg1 : i32, i32, i32
  }
  func.func @transform_7(%arg0: i32, %arg1: i32, %arg2: i32) -> (i32, i32, i32) {
    %c0_i32 = arith.constant 0 : i32
    %c0_i32_0 = arith.constant 0 : i32
    return %arg0, %c0_i32, %arg1 : i32, i32, i32
  }
}

</mosaic_0001>

<bundles_post_ra>
// kernel: tpu_custom_call.1
= control target key start
LH: loop header
LB: loop body
LE: loop exit
PB: predicated region body
PF: predicated region fallthrough
CT: control target
= control target key end

     0   :  { %s2017_s0 = inlined_call_operand.vmem [shape: s32[2,8,1], index: 0, kind: input, shape index: {}]   ;;  %s2018_s1 = inlined_call_operand.vmem [shape: f32[2,8,32], index: 1, kind: input, shape index: {}]   ;;  %s2019_s2 = inlined_call_operand.hbm [shape: f32[2,1,32], index: 2, kind: input, shape index: {}]   ;;  %s2020_s3 = inlined_call_operand.hbm [shape: f32[4,8,16], index: 3, kind: input, shape index: {}]   ;;  %s2021_s4 = inlined_call_operand.vmem [shape: f32[4,1,16], index: 4, kind: input, shape index: {}]   ;;  %s2022_s5 = inlined_call_operand.vmem [shape: f32[4,1,8], index: 5, kind: input, shape index: {}]   ;;  %s2023_s6 = inlined_call_operand.hbm [shape: f32[2,8,32], index: 6, kind: output, shape index: {0}]   ;;  %s2024_s7 = inlined_call_operand.hbm [shape: f32[2,1,32], index: 7, kind: output, shape index: {1}]  }
   0x1   :  { %2029 = sst [smem:[#allocation17_spill]] %s2020_s3 }
   0x2   :  { %13 = vsyncpa [#allocation6], 0 }
   0x3   :  { %15 = vsyncpa [#allocation6 + $0x1], 0 }
   0x4   :  { %16 = vsyncpa [#allocation9], 0 }
   0x5   :  { %17 = vsyncpa [#allocation7], 0 }
   0x6   :  { %19 = vsyncpa [#allocation7 + $0x1], 0 }
   0x7   :  { %20 = vsyncpa [#allocation12], 0 }
   0x8   :  { %22 = vsyncpa [#allocation12 + $0x1], 0  ;;  %s1683_s24 = smov 0   ;;  %s1685_s25 = smov 0  }
   0x9   :  { %s1687_s26 = smov 0   ;;  %s1689_s27 = smov 0  }
   0xa   :  { %s1691_s28 = smov 0   ;;  %s1693_s29 = smov 0  }
   0xb LB: > { %s1257_s30 = sadd.s32 4294967295, %s1626_s29   ;;  %s1258_s8 = sadd.s32 4294967294, %s1626_s29   ;;  %s1626_s29 = sphi %s1693_s29, %s28_s29   ;;  %s1622_s28 = sphi %s1691_s28, %s2049_s28   ;;  %s1618_s27 = sphi %s1689_s27, %s2048_s27   ;;  %s1614_s26 = sphi %s1687_s26, %s2047_s26   ;;  %s1610_s25 = sphi %s1685_s25, %s2046_s25   ;;  %s1606_s24 = sphi %s1683_s24, %s2045_s24  }
   0xc   : > { %p127_p0 = scmp.ne.s32.totalorder %s1610_s25, %s1606_s24  ;;  %p1717_p1 = scmp.eq.s32.totalorder %s1257_s30, 0 }
   0xd   : > { %p1721_p2 = scmp.eq.s32.totalorder %s1257_s30, 1  ;;  %p239_p3 = scmp.eq.s32.totalorder %s1258_s8, 1 }
   0xe   : > { %s2030_s9 = scalar_select %p1717_p1, 1, 0 }
   0xf   : > { %s2031_s10 = scalar_select %p1721_p2, 1, 0 }
  0x10   : > { %p1727_p4 = por %p1717_p1, %p127_p0  ;;  %p1259_p5 = scmp.ge.s32.totalorder %s1626_s29, 1 }
  0x11   : > { %p1732_p6 = por %p239_p3, %p127_p0  ;;  %p274_p7 = scmp.lt.s32.totalorder %s1626_s29, 3 }
  0x12   : > { %s2032_s11 = scalar_select %p1727_p4, 1, 0 }
  0x13   : > { %s2033_s12 = scalar_select %p1732_p6, 1, 0 }
  0x14   : > { %p1737_p8 = pnand %p1259_p5, %p274_p7  ;;  %s1628_s14 = smov [#allocation8]  }
  0x15   : > { %s289_s15 = sshll.u32 %s1628_s14, 4  ;;  %s47_s17 = sadd.s32 1, %s1622_s28  ;;  %s290_s15 = int_to_ptr.vmem [resolvable:$true] %s289_s15 }
  0x16   : > { %s2034_s13 = scalar_select %p1737_p8, 1, 0 }
  0x17   : > { %p1337_p9 = pneg %p1737_p8  ;;  %s2036_s3 = sld [smem:[#allocation17_spill]] }
  0x19   : > { %p1746_p11 = pnand %p1337_p9, %p1717_p1 }
  0x1b   : > { %p1452_p13 = pneg %p1746_p11 }
  0x1d   : > { %s1450_s20 = scalar_lea.hbm %s2036_s3, 512 }
  0x1e   : > { %p1451_p12 = scmp.ne.s32.totalorder %s2036_s3, %s1450_s20  ;;  %p1457_p5 = scmp.lt.u32.totalorder %s1450_s20, %s2036_s3 }
  0x20   : > { %p1453_p0 = pnand %p1452_p13, %p1451_p12 }
  0x22   : > { %p1454_p3 = pneg %p1453_p0 }
  0x24   : > { %p1459_p7 = pnand %p1457_p5, %p1454_p3 }
  0x26   : > { %1462 = shalt.err (!%p1459_p7)
}
  0x27   : > { %s1463_s8 = scalar_lea.vmem %s290_s15, 512  ;;  %p1471_p1 = scmp.lt.s32.totalorder %s290_s15, %s290_s15 }
  0x28   : > { %p1464_p9 = scmp.ne.s32.totalorder %s290_s15, %s1463_s8  ;;  %p1472_p4 = scmp.lt.s32.totalorder %s1463_s8, %s1463_s8 }
  0x2a   : > { %p1466_p10 = pnand %p1464_p9, %p1452_p13  ;;  %p1473_p8 = por %p1472_p4, %p1471_p1 }
  0x2c   : > { %p1467_p6 = pneg %p1466_p10 }
  0x2e   : > { %p1474_p2 = pnand %p1473_p8, %p1467_p6 }
  0x30   : > { %1477 = shalt.err (!%p1474_p2)
}
  0x31   : > { %s1629_s14 = smov 128   ;;  %s1630_s18 = smov 8  }
  0x32   : > { %1340 = dma.hbm_to_vmem [thread:$0]  (!%p1746_p11), %s2036_s3, 512, %s290_s15, [#allocation9], %s1629_s14, %s1629_s14, %s1630_s18  }
  0x33   : > { %p49_p1 = scmp.ge.s32.totalorder %s47_s17, 2  ;;  %p121_p2 = scmp.ne.s32.totalorder %s1614_s26, %s1610_s25 }
  0x34   : > { %p122_p4 = scmp.eq.s32.totalorder %s1626_s29, 0  ;;  %s114_s21 = sadd.s32 1, %s1614_s26 }
  0x35   : > { %s2051_s17 = smov (%p49_p1, %s47_s17), 0  ;;  %p2037_p6 = scmp.ne.s32.totalorder %s2031_s10, 0 }
  0x36   : > { %s109_s23 = ssub.s32 %s1622_s28, %s2051_s17  ;;  %p123_p10 = por %p122_p4, %p121_p2 }
  0x37   : > { %p1775_p8 = por %p2037_p6, %p121_p2  ;;  %p112_p12 = scmp.eq.s32.totalorder %s109_s23, 0 }
  0x38   : > { %s342_s16 = sand.u32 1, %s1614_s26   ;;  %p1353_p13 = scmp.lt.s32.totalorder %s1626_s29, 2 }
  0x39   : > { %s1784_s30 = scalar_select %p112_p12, %s1614_s26, %s114_s21  }
  0x3a   : > { %s1264_s15 = sshll.u32 %s1622_s28, 4  ;;  %s345_s8 = scalar_lea.vmem [#allocation5], %s342_s16 }
  0x3b   : > { %s353_s14 = sshll.u32 %s345_s8, 4  ;;  %s1790_s20 = scalar_lea.hbm %s2019_s2, %s1264_s15  ;;  %s1792_s14 = int_to_ptr.vmem [resolvable:$true] %s353_s14 }
  0x3c   : > { %p1794_p11 = pnand %p1353_p13, %p123_p10  ;;  %s343_s21 = scalar_lea.sflag [#allocation6], %s342_s16 }
  0x3d   : > { %s1478_s23 = scalar_lea.hbm %s1790_s20, 16  ;;  %s1483_s18 = scalar_lea.hbm %s2019_s2, 32 }
  0x3e   : > { %p1479_p0 = scmp.ne.s32.totalorder %s1790_s20, %s1478_s23  ;;  %p1480_p3 = pneg %p1794_p11 }
  0x3f   : > { %p1484_p9 = scmp.lt.u32.totalorder %s1790_s20, %s2019_s2  ;;  %p1485_p1 = scmp.lt.u32.totalorder %s1483_s18, %s1478_s23 }
  0x40   : > { %p1481_p5 = pnand %p1480_p3, %p1479_p0  ;;  %p1487_p4 = scmp.lt.u32.totalorder %s1478_s23, %s1790_s20 }
  0x41   : > { %p1486_p2 = por %p1485_p1, %p1484_p9 }
  0x42   : > { %p1482_p7 = pneg %p1481_p5 }
  0x43   : > { %p1488_p6 = por %p1487_p4, %p1486_p2 }
  0x45   : > { %p1489_p10 = pnand %p1488_p6, %p1482_p7 }
  0x47   : > { %1492 = shalt.err (!%p1489_p10)
}
  0x48   : > { %s1493_s16 = scalar_lea.vmem %s1792_s14, 16  ;;  %s1631_s15 = smov [#allocation5]  }
  0x49   : > { %p1494_p12 = scmp.ne.s32.totalorder %s1792_s14, %s1493_s16  ;;  %s1498_s8 = sshll.u32 %s1631_s15, 4  ;;  %s1499_s8 = int_to_ptr.vmem [resolvable:$false] %s1498_s8 }
  0x4a   : > { %s1500_s3 = scalar_lea.vmem %s1499_s8, 32  ;;  %p1501_p5 = scmp.lt.s32.totalorder %s1792_s14, %s1499_s8 }
  0x4b   : > { %p1496_p13 = pnand %p1494_p12, %p1480_p3  ;;  %p1502_p9 = scmp.lt.s32.totalorder %s1500_s3, %s1493_s16 }
  0x4d   : > { %p1497_p0 = pneg %p1496_p13  ;;  %p1503_p1 = por %p1502_p9, %p1501_p5 }
  0x4f   : > { %p1504_p2 = pnand %p1503_p1, %p1497_p0 }
  0x51   : > { %1507 = shalt.err (!%p1504_p2)
}
  0x52   : > { %1344 = dma.hbm_to_vmem [thread:$0]  (!%p1794_p11), %s1790_s20, 16, %s1792_s14, %s343_s21  }
  0x53   : > { %p2040_p7 = scmp.ne.s32.totalorder %s2034_s13, 0 }
  0x54   : > { %s1826_s23 = sand.u32 (!%p2040_p7), 1, %s1610_s25   ;;  %p2041_p3 = scmp.ne.s32.totalorder (!%p2040_p7), %s2032_s11, 0 }
  0x55   : > { %362 = sbr.rel (%p2040_p7) target bundleno = 689 (0x2b1), region = 44  ;;  %s365_s18 = scalar_lea.sflag (!%p2040_p7), [#allocation6], %s1826_s23 }
  0x56   : > { %s367_s19 = scalar_lea.vmem (!%p2040_p7), [#allocation5], %s1826_s23 }
  0x5c   : > { %1589 = dma.done.wait (%p2041_p3), %s365_s18, 16  }
  0x5d   : > { %1591 = vsyncadd (%p2041_p3), %s365_s18, 4294967280  ;;  %p2042_p4 = scmp.ne.s32.totalorder %s2030_s9, 0 }
  0x5f   : > { %1593 = dma.done.wait (%p2042_p4), [#allocation9], 512  }
  0x60   : > { %1595 = vsyncadd (%p2042_p4), [#allocation9], 4294966784  ;;  %p430_p11 = scmp.lt.s32.totalorder %s1618_s27, 1  ;;  %v1632_v0 = vmov 0.0   ;;  %vm1633_vm0 = vmmov 0   ;;  %v1634_v1 = vmov 0  }
  0x61   : > { %1307 = vmatprep.subr.mxu0 %v1632_v0  ;;  %1309 = vmatprep.mubr.msk.f32.mxu0 %vm1633_vm0, %v1632_v0  ;;  %vm479_vm1 = vcmask 64512   ;;  %v471_v3 = vld [vmem:[#allocation8] sm:$0xff]  ;;  %v607_v4 = vld [vmem:[#allocation8 + $0x8] sm:$0xff]  ;;  %s1635_s15 = smov 120   ;;  %v733_v5 = vld [vmem:[#allocation8 + $0x10] sm:$0xff]  ;;  %s1636_s8 = smov 104  }
  0x62   : > { %s431_s13 = scalar_select %p430_p11, %s1618_s27, 1  ;;  %1312 = vmatprep.subr.mxu1 %v1632_v0  ;;  %1314 = vmatprep.mubr.msk.f32.mxu1 %vm1633_vm0, %v1632_v0  ;;  %v1274_v7 = vld [vmem:[%s2022_s5] ss:$0 sm:$0xff]  ;;  %v1286_v8 = vld [vmem:[%s2022_s5 + $0x2] ss:$0 sm:$0xff]  ;;  %v867_v13 = vld [vmem:[#allocation8 + $0x18] sm:$0xff] }
  0x63   : > { %1416 = vset.pattern.permute.xlu0 %v1634_v1  ;;  %1417 = vset.pattern.permute.xlu1 %v1634_v1  ;;  %v1292_v10 = vld [vmem:[%s2022_s5 + $0x3] ss:$0 sm:$0xff]  ;;  %v1280_v12 = vld [vmem:[%s2022_s5 + $0x1] ss:$0 sm:$0xff]  ;;  %v1271_v17 = vld [vmem:[%s2021_s4] ss:$0 sm:$0xff] }
  0x64   : > { %s1268_s11 = sshll.u32 %s431_s13, 3  ;;  %1308 = vmatpush3.msra.mxu0 %v471_v3  ;;  %1313 = vmatpush3.msra.mxu1 %v607_v4  ;;  %s1637_s13 = smov 112   ;;  %v1276_v42 = vld [vmem:[%s2021_s4 + $0x1] ss:$0 sm:$0xff]  ;;  %v1282_v46 = vld [vmem:[%s2021_s4 + $0x2] ss:$0 sm:$0xff] }
  0x65   : > { %s446_s9 = scalar_lea.vmem %s2018_s1, %s1268_s11  ;;  %s436_s16 = scalar_lea.vmem %s2017_s0, %s1268_s11  ;;  %1317 = vmatprep.subr.mxu0 %v1632_v0  ;;  %1322 = vmatprep.subr.mxu1 %v1632_v0  ;;  %v1288_v47 = vld [vmem:[%s2021_s4 + $0x3] ss:$0 sm:$0xff]  ;;  %vm463_vm9 = vcmask 253952   ;;  %vm727_vm12 = vcmask 130112   ;;  %vm857_vm13 = vcmask 195712   ;;  %vm991_vm14 = vcmask 261312  }
  0x66   : > { %v1848_v2 = vld [vmem:[%s446_s9] sm:$0xff]  ;;  %s1638_s11 = smov 8   ;;  %s1639_s21 = smov 16  }
  0x67   : > { %617 = vrot.lane.b32.xlu0 %v1848_v2, %s1635_s15  ;;  %1310 = vmatmul.mubr.msk.f32.vlgmr.msra.gmra.mrb[0].mxu0 %vm479_vm1, %v1848_v2  ;;  %v465_v6 = vld [vmem:[%s436_s16] sm:$0xff]  ;;  %s1640_s16 = smov 24   ;;  %s1296_s3 = sshll.u32 %s1618_s27, 4 }
  0x68   : > { %877 = vrot.lane.b32.xlu1 %v1848_v2, %s1636_s8  ;;  %vm466_vm2 = vcmp.eq.s32.totalorder %v465_v6, 0  ;;  %1318 = vmatpush3.msra.mxu0 %v733_v5  ;;  %s429_s18 = scalar_lea.vmem [#allocation11], %s1826_s23 }
  0x69   : > { %1319 = vmatprep.mubr.msk.f32.mxu0 %vm1633_vm0, %v1632_v0  ;;  %v1270_v9 = vsel %vm466_vm2, 1.0, %v1632_v0  ;;  %vm1036_vm2 = vcmask 261120  }
  0x6a   : > { %v469_v11 = vsub.f32 1.0, %v1270_v9 }
  0x6b   : > { %743 = vrot.lane.b32.xlu0 %v1848_v2, %s1637_s13  ;;  %s1078_s13 = sshll.u32 %s429_s18, 4  ;;  %s1948_s13 = int_to_ptr.vmem [resolvable:$true] %s1078_s13 }
  0x6c   : > { %565 = vrot.lane.b32.xlu1 %v1274_v7, %s1638_s11 }
  0x6f   : > { %830 = vrot.lane.b32.xlu0 %v1286_v8, %s1638_s11 }
  0x70   : > { %964 = vrot.lane.b32.xlu1 %v1292_v10, %s1638_s11 }
  0x73   : > { %582 = vperm.xlu0 %1416, %v469_v11  }
  0x74   : > { %588 = vperm.xlu1 %1417, %v1270_v9  }
  0x78   : > { %704 = vrot.lane.b32.xlu1 %v1280_v12, %s1638_s11 }
  0xd9   : > { %v618_v14 = vpop.permute.xlu0 %617 }
  0xda   : > { %1315 = vmatmul.mubr.msk.f32.vlgmr.msra.gmra.mrb[0].mxu1 %vm479_vm1, %v618_v14  ;;  %v878_v15 = vpop.permute.xlu1 %877 }
  0xdb   : > { %1323 = vmatpush3.msra.mxu1 %v867_v13  ;;  %1324 = vmatprep.mubr.msk.f32.mxu1 %vm1633_vm0, %v1632_v0 }
  0xdd   : > { %v744_v16 = vpop.permute.xlu0 %743 }
  0xde   : > { %1320 = vmatmul.mubr.msk.f32.vlgmr.msra.gmra.mrb[2].mxu0 %vm479_vm1, %v744_v16  ;;  %1325 = vmatmul.mubr.msk.f32.vlgmr.msra.gmra.mrb[2].mxu1 %vm479_vm1, %v878_v15  ;;  %v566_v24 = vpop.permute.xlu1 %565 }
  0xe1   : > { %v831_v31 = vpop.permute.xlu0 %830 }
  0xe2   : > { %v965_v32 = vpop.permute.xlu1 %964 }
  0xf2   : > { %v1887_v36 = vpop.permute.xlu0 %582 }
  0xf3   : > { %v1889_v38 = vpop.permute.xlu1 %588 }
  0xf7   : > { %v705_v15 = vpop.permute.xlu1 %704 }
 0x13a   : > { %v549_v18 = vpop.f32.mrb[0].mxu0 }
 0x13b   : > { %v550_v19 = vadd.f32 %v1271_v17, %v549_v18  ;;  %v1311_v20 = vpop.f32.mrb[1].mxu0 }
 0x13d   : > { %v1273_v21 = vmul.f32 -1.442695, %v550_v19 }
 0x13f   : > { %1418 = vpow2.f32 %v1273_v21 }
 0x149   : > { %v1419_v22 = vpop.eup %1418 }
 0x14a   : > { %v556_v23 = vadd.f32 1.0, %v1419_v22 }
 0x14c   : > { %1420 = vrcp.f32 %v556_v23 }
 0x156   : > { %v1880_v25 = vpop.eup %1420 }
 0x157   : > { %v568_v26 = vmul.f32 %v1880_v25, %v566_v24  ;;  %v592_v17 = vmul.f32 %v1880_v25, %v1848_v2  ;;  %v462_v24 = vld [vmem:[%s367_s19] sm:$0x1]  ;;  %s1267_s19 = sshll.u32 %s1826_s23, 3 }
 0x158   : > { %464 = vst.msk [vmem:[#allocation2] sm:$0x1] %vm463_vm9, %v462_v24 }
 0x159   : > { %v569_v27 = vmul.f32 1.442695, %v568_v26 }
 0x15b   : > { %1422 = vpow2.f32 %v569_v27 }
 0x165   : > { %v1883_v28 = vpop.eup %1422 }
 0x166   : > { %v571_v29 = vmul.f32 %v1883_v28, %v1883_v28 }
 0x168   : > { %v572_v30 = vsub.f32 1.0, %v571_v29 }
 0x16a   : > { %1424 = vrsqrt.f32 %v572_v30  ;;  %vm575_vm3 = vcmp.eq.f32.partialorder %v572_v30, inf  ;;  %v578_v34 = vand.u32 2147483648, %v572_v30  ;;  %vm577_vm4 = vcmp.eq.f32.partialorder %v572_v30, 0.0 }
 0x174   : > { %v1425_v33 = vpop.eup %1424 }
 0x175   : > { %v574_v35 = vmul.f32 %v1425_v33, %v572_v30  ;;  %v599_v33 = vmul.f32 %v1883_v28, %v1887_v36 }
 0x177   : > { %v576_v37 = vsel %vm575_vm3, %v572_v30, %v574_v35  ;;  %vm1038_vm3 = vcmask 261127  }
 0x178   : > { %v579_v39 = vsel %vm577_vm4, %v578_v34, %v576_v37 }
 0x179   : > { %v585_v40 = vmul.f32 %v1887_v36, %v579_v39 }
 0x17b   : > { %v591_v41 = vadd.f32 %v1889_v38, %v585_v40 }
 0x17d   : > { %594 = vrot.lane.b32.xlu1 %v591_v41, %s1635_s15 }
 0x1ad   : > { %v687_v43 = vpop.f32.mrb[0].mxu1 }
 0x1ae   : > { %v688_v44 = vadd.f32 %v1276_v42, %v687_v43  ;;  %v1316_v45 = vpop.f32.mrb[1].mxu1 }
 0x1b0   : > { %v1278_v48 = vmul.f32 -1.442695, %v688_v44 }
 0x1b1   : > { %v813_v49 = vpop.f32.mrb[2].mxu0  ;;  %v947_v50 = vpop.f32.mrb[2].mxu1 }
 0x1b2   : > { %1426 = vpow2.f32 %v1278_v48  ;;  %v814_v51 = vadd.f32 %v1282_v46, %v813_v49  ;;  %v948_v52 = vadd.f32 %v1288_v47, %v947_v50  ;;  %v1321_v53 = vpop.f32.mrb[3].mxu0  ;;  %v1326_v54 = vpop.f32.mrb[3].mxu1 }
 0x1b4   : > { %v1284_v55 = vmul.f32 -1.442695, %v814_v51  ;;  %v1290_v56 = vmul.f32 -1.442695, %v948_v52 }
 0x1b6   : > { %1428 = vpow2.f32 %v1284_v55 }
 0x1b7   : > { %1430 = vpow2.f32 %v1290_v56 }
 0x1bc   : > { %v1427_v57 = vpop.eup %1426 }
 0x1bd   : > { %v694_v58 = vadd.f32 1.0, %v1427_v57 }
 0x1bf   : > { %1432 = vrcp.f32 %v694_v58 }
 0x1c0   : > { %v1429_v59 = vpop.eup %1428 }
 0x1c1   : > { %v1431_v60 = vpop.eup %1430  ;;  %v820_v61 = vadd.f32 1.0, %v1429_v59 }
 0x1c2   : > { %v954_v62 = vadd.f32 1.0, %v1431_v60 }
 0x1c3   : > { %1434 = vrcp.f32 %v820_v61  ;;  %v999_v61 = vlaneseq }
 0x1c4   : > { %1436 = vrcp.f32 %v954_v62 }
 0x1c9   : > { %v1433_v63 = vpop.eup %1432 }
 0x1ca   : > { %722 = vrot.lane.b32.xlu0 %v1433_v63, %s1638_s11  ;;  %v707_v37 = vmul.f32 %v1433_v63, %v705_v15 }
 0x1cc   : > { %v708_v39 = vmul.f32 1.442695, %v707_v37 }
 0x1cd   : > { %v1435_v0 = vpop.eup %1434 }
 0x1ce   : > { %v1437_v1 = vpop.eup %1436  ;;  %v833_v3 = vmul.f32 %v1435_v0, %v831_v31  ;;  %848 = vrot.lane.b32.xlu0 %v1435_v0, %s1639_s21 }
 0x1cf   : > { %v967_v4 = vmul.f32 %v1437_v1, %v965_v32  ;;  %982 = vrot.lane.b32.xlu1 %v1437_v1, %s1640_s16  ;;  %s1045_s16 = scalar_lea.sflag [#allocation7], %s1826_s23 }
 0x1d0   : > { %v834_v5 = vmul.f32 1.442695, %v833_v3 }
 0x1d1   : > { %v968_v6 = vmul.f32 1.442695, %v967_v4 }
 0x1d2   : > { %1438 = vpow2.f32 %v834_v5 }
 0x1d3   : > { %1440 = vpow2.f32 %v968_v6 }
 0x1dc   : > { %v1439_v7 = vpop.eup %1438 }
 0x1dd   : > { %v1441_v8 = vpop.eup %1440  ;;  %v836_v9 = vmul.f32 %v1439_v7, %v1439_v7  ;;  %v859_v34 = vmul.f32 %v1439_v7, %v1887_v36 }
 0x1de   : > { %v970_v10 = vmul.f32 %v1441_v8, %v1441_v8  ;;  %v993_v35 = vmul.f32 %v1441_v8, %v1887_v36 }
 0x1df   : > { %v837_v11 = vsub.f32 1.0, %v836_v9 }
 0x1e0   : > { %v971_v12 = vsub.f32 1.0, %v970_v10 }
 0x1e1   : > { %1442 = vrsqrt.f32 %v837_v11  ;;  %vm840_vm5 = vcmp.eq.f32.partialorder %v837_v11, inf  ;;  %v843_v18 = vand.u32 2147483648, %v837_v11  ;;  %vm842_vm6 = vcmp.eq.f32.partialorder %v837_v11, 0.0 }
 0x1e2   : > { %1444 = vrsqrt.f32 %v971_v12  ;;  %vm974_vm7 = vcmp.eq.f32.partialorder %v971_v12, inf  ;;  %v977_v21 = vand.u32 2147483648, %v971_v12  ;;  %vm976_vm8 = vcmp.eq.f32.partialorder %v971_v12, 0.0 }
 0x1e3   : > { %1446 = vpow2.f32 %v708_v39 }
 0x1eb   : > { %v1443_v13 = vpop.eup %1442 }
 0x1ec   : > { %v1445_v14 = vpop.eup %1444  ;;  %v839_v16 = vmul.f32 %v1443_v13, %v837_v11 }
 0x1ed   : > { %v973_v19 = vmul.f32 %v1445_v14, %v971_v12  ;;  %v1447_v40 = vpop.eup %1446 }
 0x1ee   : > { %v841_v20 = vsel %vm840_vm5, %v837_v11, %v839_v16  ;;  %v710_v41 = vmul.f32 %v1447_v40, %v1447_v40 }
 0x1ef   : > { %v844_v22 = vsel %vm842_vm6, %v843_v18, %v841_v20  ;;  %v975_v23 = vsel %vm974_vm7, %v971_v12, %v973_v19  ;;  %v595_v26 = vpop.permute.xlu1 %594  ;;  %v1293_v18 = vld [vmem:[#allocation2] ss:$0 sm:$0xff] }
 0x1f0   : > { %v845_v27 = vmul.f32 %v844_v22, %v1887_v36  ;;  %v978_v29 = vsel %vm976_vm8, %v977_v21, %v975_v23  ;;  %v597_v30 = vmul.f32 %v595_v26, %v592_v17  ;;  %v711_v42 = vsub.f32 1.0, %v710_v41 }
 0x1f1   : > { %v979_v25 = vmul.f32 %v978_v29, %v1887_v36 }
 0x1f2   : > { %v846_v31 = vadd.f32 %v845_v27, %v1889_v38  ;;  %598 = vst.msk [vmem:[#allocation4] sm:$0xff] %vm479_vm1, %v597_v30  ;;  %1448 = vrsqrt.f32 %v711_v42  ;;  %vm714_vm10 = vcmp.eq.f32.partialorder %v711_v42, inf  ;;  %v717_v45 = vand.u32 2147483648, %v711_v42 }
 0x1f3   : > { %v980_v32 = vadd.f32 %v979_v25, %v1889_v38  ;;  %vm716_vm11 = vcmp.eq.f32.partialorder %v711_v42, 0.0 }
 0x1f4   : > { %853 = vrot.lane.b32.xlu0 %v846_v31, %s1638_s11 }
 0x1f5   : > { %987 = vrot.lane.b32.xlu1 %v980_v32, %s1639_s21 }
 0x1f8   : > { %601 = vrot.lane.b32.xlu0 %v599_v33, %s1635_s15  ;;  %s1295_s15 = sshll.u32 %s1618_s27, 7  ;;  %s1946_s27 = scalar_lea.hbm %s2024_s7, %s1296_s3 }
 0x1f9   : > { %861 = vrot.lane.b32.xlu1 %v859_v34, %s1638_s11  ;;  %s423_s11 = scalar_lea.vmem [#allocation10], %s1267_s19  ;;  %s1939_s9 = scalar_lea.hbm %s2023_s6, %s1295_s15 }
 0x1fa   : > { %s1064_s8 = sshll.u32 %s423_s11, 4  ;;  %s1641_s15 = smov [#allocation10]   ;;  %s1941_s8 = int_to_ptr.vmem [resolvable:$true] %s1064_s8 }
 0x1fb   : > { %s1508_s19 = scalar_lea.vmem %s1941_s8, 128  ;;  %s1512_s14 = sshll.u32 %s1641_s15, 4  ;;  %s1513_s14 = int_to_ptr.vmem [resolvable:$false] %s1512_s14 }
 0x1fc   : > { %995 = vrot.lane.b32.xlu0 %v993_v35, %s1639_s21  ;;  %v1449_v43 = vpop.eup %1448  ;;  %p1509_p6 = scmp.ne.s32.totalorder %s1941_s8, %s1508_s19  ;;  %s1514_s20 = scalar_lea.vmem %s1513_s14, 256 }
 0x1fd   : > { %v713_v44 = vmul.f32 %v1449_v43, %v711_v42  ;;  %p1515_p13 = scmp.lt.s32.totalorder %s1941_s8, %s1513_s14  ;;  %p1516_p0 = scmp.lt.s32.totalorder %s1514_s20, %s1508_s19 }
 0x1fe   : > { %p1510_p10 = pnand %p1509_p6, %p1775_p8 }
 0x1ff   : > { %v715_v28 = vsel %vm714_vm10, %v711_v42, %v713_v44  ;;  %p1517_p5 = por %p1516_p0, %p1515_p13 }
 0x200   : > { %v718_v46 = vsel %vm716_vm11, %v717_v45, %v715_v28  ;;  %p1511_p12 = pneg %p1510_p10 }
 0x201   : > { %v719_v47 = vmul.f32 %v718_v46, %v1887_v36 }
 0x202   : > { %p1518_p9 = pnand %p1517_p5, %p1511_p12 }
 0x203   : > { %v720_v49 = vadd.f32 %v719_v47, %v1889_v38  ;;  %v729_v38 = vmul.f32 %v1447_v40, %v1887_v36 }
 0x23c   : > { %v723_v48 = vpop.permute.xlu0 %722 }
 0x23d   : > { %v725_v50 = vmul.f32 %v723_v48, %v1848_v2 }
 0x23f   : > { %v726_v51 = vmul.f32 %v725_v50, %v720_v49 }
 0x240   : > { %v849_v52 = vpop.permute.xlu0 %848 }
 0x241   : > { %728 = vst.msk [vmem:[#allocation4] sm:$0xff] %vm727_vm12, %v726_v51  ;;  %v983_v53 = vpop.permute.xlu1 %982  ;;  %v851_v54 = vmul.f32 %v849_v52, %v1848_v2 }
 0x242   : > { %v985_v55 = vmul.f32 %v983_v53, %v1848_v2  ;;  %v1000_v2 = vshrl.u32 %v999_v61, 7 }
 0x244   : > { %vm1004_vm15 = vcmp.ge.s32.totalorder %v1000_v2, 1  ;;  %vm1012_vm0 = vcmp.ge.s32.totalorder %v1000_v2, 2 }
 0x266   : > { %v854_v56 = vpop.permute.xlu0 %853 }
 0x267   : > { %v988_v57 = vpop.permute.xlu1 %987  ;;  %v856_v58 = vmul.f32 %v854_v56, %v851_v54 }
 0x268   : > { %v990_v59 = vmul.f32 %v988_v57, %v985_v55 }
 0x269   : > { %858 = vst.msk [vmem:[#allocation4] sm:$0xff] %vm857_vm13, %v856_v58 }
 0x26a   : > { %v602_v60 = vpop.permute.xlu0 %601  ;;  %992 = vst.msk [vmem:[#allocation4] sm:$0xff] %vm991_vm14, %v990_v59 }
 0x26b   : > { %604 = vst.msk [vmem:[#allocation3] sm:$0xff] %vm479_vm1, %v602_v60  ;;  %v862_v62 = vpop.permute.xlu1 %861  ;;  %vm1020_vm1 = vcmp.ge.s32.totalorder %v1000_v2, 4 }
 0x26c   : > { %730 = vst.msk [vmem:[#allocation3] sm:$0xff] %vm727_vm12, %v729_v38 }
 0x26d   : > { %864 = vst.msk [vmem:[#allocation3] sm:$0xff] %vm857_vm13, %v862_v62 }
 0x26e   : > { %v996_v63 = vpop.permute.xlu0 %995 }
 0x26f   : > { %998 = vst.msk [vmem:[#allocation3] sm:$0xff] %vm991_vm14, %v996_v63 }
 0x271   : > { %v1003_v0 = vld [vmem:[#allocation4] sm:$0xff] }
 0x272   : > { %v1007_v1 = vrot.slane %v1003_v0, 7 }
 0x274   : > { %v1008_v4 = vsel %vm1004_vm15, %v1007_v1, 0.0 }
 0x276   : > { %v1002_v3 = vld [vmem:[#allocation3] sm:$0xff] }
 0x277   : > { %v1005_v5 = vrot.slane %v1002_v3, 7  ;;  %v1009_v36 = vmul.f32 %v1008_v4, %v1002_v3 }
 0x279   : > { %v1006_v6 = vsel %vm1004_vm15, %v1005_v5, 1.0  ;;  %v1010_v7 = vadd.f32 %v1009_v36, %v1003_v0 }
 0x27a   : > { %v1011_v8 = vmul.f32 %v1006_v6, %v1002_v3 }
 0x27b   : > { %v1015_v9 = vrot.slane %v1010_v7, 6 }
 0x27c   : > { %v1013_v10 = vrot.slane %v1011_v8, 6 }
 0x27d   : > { %v1016_v11 = vsel %vm1012_vm0, %v1015_v9, 0.0 }
 0x27e   : > { %v1014_v12 = vsel %vm1012_vm0, %v1013_v10, 1.0  ;;  %v1017_v13 = vmul.f32 %v1016_v11, %v1011_v8 }
 0x27f   : > { %v1019_v14 = vmul.f32 %v1014_v12, %v1011_v8 }
 0x280   : > { %v1018_v15 = vadd.f32 %v1017_v13, %v1010_v7 }
 0x281   : > { %v1021_v16 = vrot.slane %v1019_v14, 4 }
 0x282   : > { %v1023_v17 = vrot.slane %v1018_v15, 4 }
 0x283   : > { %v1022_v19 = vsel %vm1020_vm1, %v1021_v16, 1.0 }
 0x284   : > { %v1024_v20 = vsel %vm1020_vm1, %v1023_v17, 0.0  ;;  %v1027_v21 = vmul.f32 %v1022_v19, %v1019_v14 }
 0x285   : > { %v1025_v22 = vmul.f32 %v1024_v20, %v1019_v14 }
 0x286   : > { %v1034_v23 = vmul.f32 %v1293_v18, %v1027_v21 }
 0x287   : > { %v1026_v24 = vadd.f32 %v1025_v22, %v1018_v15 }
 0x289   : > { %v1035_v26 = vadd.f32 %v1034_v23, %v1026_v24 }
 0x28b   : > { %1037 = vst.msk [vmem:[%s423_s11] sm:$0xff] %vm1036_vm2, %v1035_v26 }
 0x28c   : > { %1039 = vst.msk [vmem:[#allocation2 - $0x7] sm:$0x80] %vm1038_vm3, %v1035_v26  ;;  %1043 = vst.msk [vmem:[%s429_s18 - $0x7] sm:$0x80] %vm1038_vm3, %v1035_v26 }
 0x28d   : > { %1521 = shalt.err (!%p1518_p9)
}
 0x28e   : > { %s1522_s11 = scalar_lea.hbm %s1939_s9, 128  ;;  %s1526_s10 = scalar_lea.hbm %s2023_s6, 256 }
 0x28f   : > { %p1523_p1 = scmp.ne.s32.totalorder %s1939_s9, %s1522_s11  ;;  %p1527_p3 = scmp.lt.u32.totalorder %s1939_s9, %s2023_s6 }
 0x290   : > { %p1528_p4 = scmp.lt.u32.totalorder %s1526_s10, %s1522_s11  ;;  %p1530_p6 = scmp.lt.u32.totalorder %s1522_s11, %s1939_s9 }
 0x291   : > { %p1524_p2 = pnand %p1523_p1, %p1775_p8 }
 0x292   : > { %p1529_p11 = por %p1528_p4, %p1527_p3 }
 0x293   : > { %p1525_p7 = pneg %p1524_p2 }
 0x294   : > { %p1531_p10 = por %p1530_p6, %p1529_p11 }
 0x296   : > { %p1532_p12 = pnand %p1531_p10, %p1525_p7 }
 0x298   : > { %1535 = shalt.err (!%p1532_p12)
}
 0x299   : > { %1333 = dma.vmem_to_hbm [thread:$0]  (%p1775_p8), %s1941_s8, 128, %s1939_s9, %s1045_s16  }
 0x29a   : > { %s1050_s19 = scalar_lea.sflag [#allocation12], %s1826_s23  ;;  %s1536_s14 = scalar_lea.vmem %s1948_s13, 16 }
 0x29b   : > { %p1537_p13 = scmp.ne.s32.totalorder %s1948_s13, %s1536_s14  ;;  %s1642_s20 = smov [#allocation11]  }
 0x29c   : > { %s1540_s11 = sshll.u32 %s1642_s20, 4  ;;  %s1541_s11 = int_to_ptr.vmem [resolvable:$false] %s1540_s11 }
 0x29d   : > { %p1538_p0 = pnand %p1537_p13, %p1775_p8  ;;  %s1542_s3 = scalar_lea.vmem %s1541_s11, 32 }
 0x29e   : > { %p1543_p9 = scmp.lt.s32.totalorder %s1948_s13, %s1541_s11  ;;  %p1544_p1 = scmp.lt.s32.totalorder %s1542_s3, %s1536_s14 }
 0x29f   : > { %p1539_p5 = pneg %p1538_p0 }
 0x2a0   : > { %p1545_p2 = por %p1544_p1, %p1543_p9 }
 0x2a2   : > { %p1546_p7 = pnand %p1545_p2, %p1539_p5 }
 0x2a4   : > { %1549 = shalt.err (!%p1546_p7)
}
 0x2a5   : > { %s1550_s23 = scalar_lea.hbm %s1946_s27, 16  ;;  %s1554_s16 = scalar_lea.hbm %s2024_s7, 32 }
 0x2a6   : > { %p1551_p3 = scmp.ne.s32.totalorder %s1946_s27, %s1550_s23  ;;  %p1555_p6 = scmp.lt.u32.totalorder %s1946_s27, %s2024_s7 }
 0x2a7   : > { %p1556_p10 = scmp.lt.u32.totalorder %s1554_s16, %s1550_s23  ;;  %p1558_p13 = scmp.lt.u32.totalorder %s1550_s23, %s1946_s27 }
 0x2a8   : > { %p1552_p4 = pnand %p1551_p3, %p1775_p8 }
 0x2a9   : > { %p1557_p12 = por %p1556_p10, %p1555_p6 }
 0x2aa   : > { %p1553_p11 = pneg %p1552_p4 }
 0x2ab   : > { %p1559_p0 = por %p1558_p13, %p1557_p12 }
 0x2ad   : > { %p1560_p5 = pnand %p1559_p0, %p1553_p11 }
 0x2af   : > { %1563 = shalt.err (!%p1560_p5)
}
 0x2b0   : > { %1334 = dma.vmem_to_hbm [thread:$0]  (%p1775_p8), %s1948_s13, 16, %s1946_s27, %s1050_s19  }
 0x2b1 PF: > { %s1090_s21 = sand.u32 1, %s1606_s24   ;;  %p2043_p9 = scmp.ne.s32.totalorder %s2033_s12, 0 }
 0x2b2   : > { %p2044_p1 = scmp.ge.s32.totalorder %s1626_s29, 2  ;;  %s1091_s15 = scalar_lea.sflag [#allocation7], %s1090_s21 }
 0x2b4   : > { %p1346_p2 = pnand %p2044_p1, %p2043_p9 }
 0x2b6   : > { %1597 = dma.done.wait (!%p1346_p2), %s1091_s15, 128  }
 0x2b7   : > { %1599 = vsyncadd (!%p1346_p2), %s1091_s15, 4294967168  ;;  %s1100_s14 = scalar_lea.sflag [#allocation12], %s1090_s21 }
 0x2b8   : > { %1601 = dma.done.wait (!%p1346_p2), %s1100_s14, 16  }
 0x2b9   : > { %1603 = vsyncadd (!%p1346_p2), %s1100_s14, 4294967280  ;;  %s28_s29 = sadd.s32 1, %s1626_s29   ;;  %s2045_s24 = smov %s1610_s25 }
 0x2ba   : > { %p25_p7 = scmp.ge.s32.totalorder %s28_s29, 4   ;;  %s2046_s25 = smov %s1614_s26 }
 0x2bb   : > { %s2047_s26 = smov %s1784_s30  ;;  %s2048_s27 = smov %s1622_s28 }
 0x2bc   : > { %s2049_s28 = smov %s2051_s17  ;;  %27 = sbr.rel (!%p25_p7) target bundleno = 11 (0xb), region = 140 }
 0x2c3   :  { %1104 = vsyncpa [#allocation6], 1 }
 0x2c4   :  { %1106 = vsyncpa [#allocation6 + $0x1], 1 }
 0x2c5   :  { %1107 = vsyncpa [#allocation9], 1 }
 0x2c6   :  { %1108 = vsyncpa [#allocation7], 1 }
 0x2c7   :  { %1110 = vsyncpa [#allocation7 + $0x1], 1 }
 0x2c8   :  { %1111 = vsyncpa [#allocation12], 1 }
 0x2c9   :  { %1113 = vsyncpa [#allocation12 + $0x1], 1 }

</bundles_post_ra>
